<compile_context>
chip_gen: v6e
topology: v6e:2x2x1
jax: 0.10.0
libtpu: 0.0.40
codegen_flags: <defaults>
</compile_context>

<pallas_src>
import functools

import jax
import jax.numpy as jnp
from jax.experimental import pallas as pl
from jax.experimental.pallas import tpu as pltpu


# ----------------------------- Pallas kernel ------------------------------ #
def linear_kernel(x_ref, w_ref, b_ref, o_ref, acc_ref):
    """One (tm, tn) output tile of  Z = X @ W + b, reduced over grid axis 2.

    x_ref: [tm, tk]  input-feature tile
    w_ref: [tk, tn]  weight tile (already transposed to [F, C] layout)
    b_ref: [1,  tn]  bias tile
    o_ref: [tm, tn]  output tile
    acc_ref: [tm, tn] f32 VMEM accumulator (persists across the k axis)
    """
    k = pl.program_id(2)

    @pl.when(k == 0)
    def _():
        acc_ref[...] = jnp.zeros_like(acc_ref)

    acc_ref[...] += jnp.dot(x_ref[...], w_ref[...],
                            preferred_element_type=jnp.float32)

    @pl.when(k == pl.num_programs(2) - 1)
    def _():
        o_ref[...] = (acc_ref[...] + b_ref[...]).astype(o_ref.dtype)


# ------------------------------- Wrapper ----------------------------------- #
def _round_up(x, m):
    return (x + m - 1) // m * m


@functools.partial(jax.jit, static_argnames=("tm", "tn", "tk"))
def logistic_regression_forward(x, w, b, *, tm=128, tn=128, tk=128):
    """Pallas forward of nn.Linear: z = x @ w.T + b.

    x: [M, F] float32   (batch of feature vectors)
    w: [C, F] float32   (torch nn.Linear weight layout)
    b: [C]    float32
    returns [M, C] float32
    """
    m, f = x.shape
    c = w.shape[0]

    # Pad every dim to 128-aligned tile multiples (lane-dense output).
    mp, fp, cp = _round_up(m, tm), _round_up(f, tk), _round_up(c, tn)
    xp = jnp.zeros((mp, fp), jnp.float32).at[:m, :f].set(x)
    wp = jnp.zeros((fp, cp), jnp.float32).at[:f, :c].set(w.T)   # [F, C]
    bp = jnp.zeros((1, cp), jnp.float32).at[0, :c].set(b)

    grid = (mp // tm, cp // tn, fp // tk)

    zp = pl.pallas_call(
        linear_kernel,
        out_shape=jax.ShapeDtypeStruct((mp, cp), jnp.float32),
        grid_spec=pltpu.PrefetchScalarGridSpec(
            num_scalar_prefetch=0,
            grid=grid,
            in_specs=[
                pl.BlockSpec((tm, tk), lambda i, j, k: (i, k)),   # X tile
                pl.BlockSpec((tk, tn), lambda i, j, k: (k, j)),   # W tile
                pl.BlockSpec((1, tn), lambda i, j, k: (0, j)),    # bias tile
            ],
            out_specs=pl.BlockSpec((tm, tn), lambda i, j, k: (i, j)),
            scratch_shapes=[pltpu.VMEM((tm, tn), jnp.float32)],
        ),
        compiler_params=pltpu.CompilerParams(
            dimension_semantics=("parallel", "parallel", "arbitrary"),
            vmem_limit_bytes=32 * 1024 * 1024,
        ),
    )(xp, wp, bp)

    return zp[:m, :c]


# ------------------------------ Param setup -------------------------------- #
def init_logistic_regression(key, num_features, num_classes):
    """Matches the PyTorch module: xavier_uniform_ weight, default-Linear bias."""
    k_w, k_b = jax.random.split(key)
    limit = float(jnp.sqrt(6.0 / (num_features + num_classes)))
    w = jax.random.uniform(k_w, (num_classes, num_features), jnp.float32,
                           -limit, limit)
    bound = 1.0 / float(jnp.sqrt(float(num_features)))          # nn.Linear default
    b = jax.random.uniform(k_b, (num_classes,), jnp.float32, -bound, bound)
    return w, b


# ----------------------------- Reference (JAX) ------------------------------ #
def logistic_regression_reference(x, w, b):
    return x @ w.T + b


# ---------------------------------- Main ------------------------------------ #
if __name__ == "__main__":
    M = 256            # batch of node embeddings
    NUM_FEATURES = 256
    NUM_CLASSES = 10

    key = jax.random.PRNGKey(0)
    k_x, k_params = jax.random.split(key)

    x = jax.random.normal(k_x, (M, NUM_FEATURES), jnp.float32)
    w, b = init_logistic_regression(k_params, NUM_FEATURES, NUM_CLASSES)

    z = logistic_regression_forward(x, w, b)
    z = jax.block_until_ready(z)

    ref = logistic_regression_reference(x, w, b)
    assert z.shape == (M, NUM_CLASSES)
    assert jnp.allclose(z, ref, atol=1e-4, rtol=1e-4), "mismatch vs JAX reference"

    print("KERNEL_OK")
</pallas_src>

<mosaic_0001>
module attributes {stable_mosaic.version = 11 : i64} {
  func.func @linear_kernel(%arg0: i32, %arg1: i32, %arg2: i32, %arg3: memref<128x128xf32, #tpu.memory_space<vmem>>, %arg4: memref<128x128xf32, #tpu.memory_space<vmem>>, %arg5: memref<1x128xf32, #tpu.memory_space<vmem>>, %arg6: memref<128x128xf32, #tpu.memory_space<vmem>>, %arg7: memref<128x128xf32, #tpu.memory_space<vmem>>) attributes {dimension_semantics = [#tpu.dimension_semantics<parallel>, #tpu.dimension_semantics<parallel>, #tpu.dimension_semantics<arbitrary>], iteration_bounds = array<i64: 2, 1, 2>, scalar_prefetch = 0 : i64, scratch_operands = 1 : i64, tpu.core_type = #tpu.core_type<tc>, window_params = [{transform_indices = @transform_0, window_bounds = array<i64: 128, 128>}, {transform_indices = @transform_1, window_bounds = array<i64: 128, 128>}, {transform_indices = @transform_2, window_bounds = array<i64: 1, 128>}, {transform_indices = @transform_3, window_bounds = array<i64: 128, 128>}]} {
    %c0_i32 = arith.constant 0 : i32
    %0 = arith.cmpi eq, %arg2, %c0_i32 : i32
    %1 = arith.extui %0 : i1 to i32
    %c0_i32_0 = arith.constant 0 : i32
    %2 = arith.cmpi ne, %1, %c0_i32_0 : i32
    scf.if %2 {
      %cst_9 = arith.constant 0.000000e+00 : f32
      %12 = vector.broadcast %cst_9 : f32 to vector<128x128xf32>
      %c0_10 = arith.constant 0 : index
      %c0_11 = arith.constant 0 : index
      %13 = vector.load %arg7[%c0_10, %c0_11] : memref<128x128xf32, #tpu.memory_space<vmem>>, vector<128x128xf32>
      tpu.vector_store %arg7[%c0_10, %c0_11], %12 {strides = array<i32>} : memref<128x128xf32, #tpu.memory_space<vmem>>, vector<128x128xf32>,
    } else {
    }
    %c0 = arith.constant 0 : index
    %c0_1 = arith.constant 0 : index
    %3 = vector.load %arg7[%c0, %c0_1] : memref<128x128xf32, #tpu.memory_space<vmem>>, vector<128x128xf32>
    %c0_2 = arith.constant 0 : index
    %c0_3 = arith.constant 0 : index
    %4 = vector.load %arg3[%c0_2, %c0_3] : memref<128x128xf32, #tpu.memory_space<vmem>>, vector<128x128xf32>
    %c0_4 = arith.constant 0 : index
    %c0_5 = arith.constant 0 : index
    %5 = vector.load %arg4[%c0_4, %c0_5] : memref<128x128xf32, #tpu.memory_space<vmem>>, vector<128x128xf32>
    %cst = arith.constant dense<0.000000e+00> : vector<128x128xf32>
    %6 = tpu.matmul %4, %5, %cst {dimension_numbers = #tpu.dot_dimension_numbers<[1], [0], [0], [1], [0, 0, 1, 1], [], []>} : vector<128x128xf32>, vector<128x128xf32>, vector<128x128xf32> -> vector<128x128xf32>
    %7 = arith.addf %3, %6 : vector<128x128xf32>
    %c0_6 = arith.constant 0 : index
    %c0_7 = arith.constant 0 : index
    %8 = vector.load %arg7[%c0_6, %c0_7] : memref<128x128xf32, #tpu.memory_space<vmem>>, vector<128x128xf32>
    tpu.vector_store %arg7[%c0_6, %c0_7], %7 {strides = array<i32>} : memref<128x128xf32, #tpu.memory_space<vmem>>, vector<128x128xf32>,
    %c1_i32 = arith.constant 1 : i32
    %9 = arith.cmpi eq, %arg2, %c1_i32 : i32
    %10 = arith.extui %9 : i1 to i32
    %c0_i32_8 = arith.constant 0 : i32
    %11 = arith.cmpi ne, %10, %c0_i32_8 : i32
    scf.if %11 {
      %c0_9 = arith.constant 0 : index
      %c0_10 = arith.constant 0 : index
      %12 = vector.load %arg7[%c0_9, %c0_10] : memref<128x128xf32, #tpu.memory_space<vmem>>, vector<128x128xf32>
      %c0_11 = arith.constant 0 : index
      %c0_12 = arith.constant 0 : index
      %13 = vector.load %arg5[%c0_11, %c0_12] : memref<1x128xf32, #tpu.memory_space<vmem>>, vector<1x128xf32>
      %14 = vector.broadcast %13 : vector<1x128xf32> to vector<128x128xf32>
      %15 = arith.addf %12, %14 : vector<128x128xf32>
      %c0_13 = arith.constant 0 : index
      %c0_14 = arith.constant 0 : index
      %16 = vector.load %arg6[%c0_13, %c0_14] : memref<128x128xf32, #tpu.memory_space<vmem>>, vector<128x128xf32>
      tpu.vector_store %arg6[%c0_13, %c0_14], %15 {strides = array<i32>} : memref<128x128xf32, #tpu.memory_space<vmem>>, vector<128x128xf32>,
    } else {
    }
    return
  }
  func.func @transform_0(%arg0: i32, %arg1: i32, %arg2: i32) -> (i32, i32) {
    %c0_i32 = arith.constant 0 : i32
    return %arg0, %arg2 : i32, i32
  }
  func.func @transform_1(%arg0: i32, %arg1: i32, %arg2: i32) -> (i32, i32) {
    %c0_i32 = arith.constant 0 : i32
    return %arg2, %arg1 : i32, i32
  }
  func.func @transform_2(%arg0: i32, %arg1: i32, %arg2: i32) -> (i32, i32) {
    %c0_i32 = arith.constant 0 : i32
    %c0_i32_0 = arith.constant 0 : i32
    return %c0_i32, %arg1 : i32, i32
  }
  func.func @transform_3(%arg0: i32, %arg1: i32, %arg2: i32) -> (i32, i32) {
    %c0_i32 = arith.constant 0 : i32
    return %arg0, %arg1 : i32, i32
  }
}

</mosaic_0001>

<bundles_post_ra>
// kernel: logistic_regression_forward.1
= control target key start
LH: loop header
LB: loop body
LE: loop exit
PB: predicated region body
PF: predicated region fallthrough
CT: control target
= control target key end

     0   :  { %s1042_s12 = smov 0   ;;  %s1044_s13 = smov 0   ;;  %s1211_s0 = inlined_call_operand.vmem [shape: f32[256,256], index: 0, kind: input, shape index: {}]   ;;  %s1212_s1 = inlined_call_operand.vmem [shape: f32[256,128], index: 1, kind: input, shape index: {}]   ;;  %s1213_s2 = inlined_call_operand.vmem [shape: f32[1,128], index: 2, kind: input, shape index: {}]   ;;  %s1214_s3 = inlined_call_operand.vmem [shape: f32[256,128], index: 3, kind: output, shape index: {}]  }
   0x1   :  { %s1046_s14 = smov 0   ;;  %s1048_s15 = smov 0  }
   0x2   :  { %s1050_s16 = smov 0   ;;  %s1052_s17 = smov 0  }
   0x3   :  { %s1054_s18 = smov 0  }
   0x4 LB: > { %s25_s19 = sadd.s32 1, %s1011_s16  ;;  %s32_s20 = sadd.s32 1, %s1015_s17  ;;  %s1019_s18 = sphi %s1054_s18, %s13_s18   ;;  %s1015_s17 = sphi %s1052_s17, %s1220_s17   ;;  %s1011_s16 = sphi %s1050_s16, %s1219_s16   ;;  %s1007_s15 = sphi %s1048_s15, %s1218_s15   ;;  %s1003_s14 = sphi %s1046_s14, %s1217_s14   ;;  %s999_s13 = sphi %s1044_s13, %s1216_s13   ;;  %s995_s12 = sphi %s1042_s12, %s1215_s12  }
   0x5   : > { %p26_p0 = scmp.ge.s32.totalorder %s25_s19, 2  ;;  %p48_p1 = scmp.ne.s32.totalorder %s999_s13, %s995_s12 }
   0x6   : > { %p49_p2 = scmp.eq.s32.totalorder %s1019_s18, 0  ;;  %s41_s24 = sadd.s32 1, %s999_s13 }
   0x7   : > { %s1222_s19 = smov (%p26_p0, %s25_s19), 0  ;;  %s1224_s20 = smov (!%p26_p0, %s32_s20), %s1015_s17 }
   0x8   : > { %p50_p3 = por %p49_p2, %p48_p1  ;;  %p34_p4 = scmp.ge.s32.totalorder %s1224_s20, 2 }
   0x9   : > { %s37_s21 = ssub.s32 %s1011_s16, %s1222_s19  ;;  %p771_p6 = scmp.ge.s32.totalorder %s1019_s18, 4 }
   0xa   : > { %s1226_s20 = smov (%p34_p4, %s1224_s20), 0 }
   0xb   : > { %s36_s22 = ssub.s32 %s1015_s17, %s1226_s20  ;;  %162 = sbr.rel (%p771_p6) target bundleno = 30 (0x1e), region = 20 }
   0xc   : > { %s38_s23 = sor.u32 %s37_s21, %s36_s22 }
   0xd   : > { %p39_p5 = scmp.eq.s32.totalorder %s38_s23, 0 }
   0xf   : > { %s1093_s25 = scalar_select %p39_p5, %s999_s13, %s41_s24  }
  0x10   : > { %165 = sbr.rel (!%p50_p3) target bundleno = 30 (0x1e), region = 24  ;;  %s167_s26 = sand.u32 (%p50_p3), 1, %s999_s13  }
  0x11   : > { %s787_s27 = sshll.u32 (%p50_p3), %s1015_s17, 5  ;;  %s772_s28 = sshll.u32 (%p50_p3), %s167_s26, 7 }
  0x12   : > { %s172_s29 = sadd.s32 (%p50_p3), %s1011_s16, %s787_s27  ;;  %s169_s7 = scalar_lea.vmem (%p50_p3), [#allocation3], %s772_s28 }
  0x13   : > { %s775_s30 = sshll.u32 (%p50_p3), %s172_s29, 3 }
  0x14   : > { %s1102_s6 = scalar_lea.vmem (%p50_p3), %s1211_s0, %s775_s30 }
  0x15   : > { %v233_v0 = vld [vmem:[%s1102_s6] sm:$0xff]  ;;  %v235_v1 = vld [vmem:[%s1102_s6 + $0x10] sm:$0xff] }
  0x16   : > { %v237_v2 = vld [vmem:[%s1102_s6 + $0x20] sm:$0xff]  ;;  %234 = vst [vmem:[%s169_s7] sm:$0xff] %v233_v0  ;;  %236 = vst [vmem:[%s169_s7 + $0x8] sm:$0xff] %v235_v1  ;;  %v239_v3 = vld [vmem:[%s1102_s6 + $0x30] sm:$0xff] }
  0x17   : > { %238 = vst [vmem:[%s169_s7 + $0x10] sm:$0xff] %v237_v2  ;;  %v241_v4 = vld [vmem:[%s1102_s6 + $0x40] sm:$0xff]  ;;  %v243_v5 = vld [vmem:[%s1102_s6 + $0x50] sm:$0xff]  ;;  %240 = vst [vmem:[%s169_s7 + $0x18] sm:$0xff] %v239_v3 }
  0x18   : > { %242 = vst [vmem:[%s169_s7 + $0x20] sm:$0xff] %v241_v4  ;;  %244 = vst [vmem:[%s169_s7 + $0x28] sm:$0xff] %v243_v5  ;;  %v245_v6 = vld [vmem:[%s1102_s6 + $0x60] sm:$0xff]  ;;  %v247_v7 = vld [vmem:[%s1102_s6 + $0x70] sm:$0xff] }
  0x19   : > { %v249_v8 = vld [vmem:[%s1102_s6 + $0x80] sm:$0xff]  ;;  %246 = vst [vmem:[%s169_s7 + $0x30] sm:$0xff] %v245_v6  ;;  %248 = vst [vmem:[%s169_s7 + $0x38] sm:$0xff] %v247_v7  ;;  %v251_v9 = vld [vmem:[%s1102_s6 + $0x90] sm:$0xff] }
  0x1a   : > { %250 = vst [vmem:[%s169_s7 + $0x40] sm:$0xff] %v249_v8  ;;  %v253_v10 = vld [vmem:[%s1102_s6 + $0xa0] sm:$0xff]  ;;  %v255_v11 = vld [vmem:[%s1102_s6 + $0xb0] sm:$0xff]  ;;  %252 = vst [vmem:[%s169_s7 + $0x48] sm:$0xff] %v251_v9 }
  0x1b   : > { %254 = vst [vmem:[%s169_s7 + $0x50] sm:$0xff] %v253_v10  ;;  %256 = vst [vmem:[%s169_s7 + $0x58] sm:$0xff] %v255_v11  ;;  %v257_v12 = vld [vmem:[%s1102_s6 + $0xc0] sm:$0xff]  ;;  %v259_v13 = vld [vmem:[%s1102_s6 + $0xd0] sm:$0xff] }
  0x1c   : > { %v261_v14 = vld [vmem:[%s1102_s6 + $0xe0] sm:$0xff]  ;;  %258 = vst [vmem:[%s169_s7 + $0x60] sm:$0xff] %v257_v12  ;;  %260 = vst [vmem:[%s169_s7 + $0x68] sm:$0xff] %v259_v13  ;;  %v263_v15 = vld [vmem:[%s1102_s6 + $0xf0] sm:$0xff] }
  0x1d   : > { %262 = vst [vmem:[%s169_s7 + $0x70] sm:$0xff] %v261_v14  ;;  %264 = vst [vmem:[%s169_s7 + $0x78] sm:$0xff] %v263_v15 }
  0x1e PF: > { %p776_p7 = scmp.ge.s32.totalorder %s1019_s18, 1  ;;  %p281_p8 = scmp.lt.s32.totalorder %s1019_s18, 5 }
  0x20   : > { %p282_p9 = pnand %p776_p7, %p281_p8 }
  0x21   : > { %s288_s8 = sand.u32 (!%p282_p9), 1, %s995_s12   ;;  %s778_s9 = sshll.u32 (!%p282_p9), %s1003_s14, 4 }
  0x22   : > { %285 = sbr.rel (%p282_p9) target bundleno = 311 (0x137), region = 66  ;;  %s777_s10 = sshll.u32 (!%p282_p9), %s288_s8, 7 }
  0x23   : > { %p327_p10 = scmp.lt.s32.totalorder (!%p282_p9), %s778_s9, 31  ;;  %s780_s11 = sshll.u32 (!%p282_p9), %s1007_s15, 4 }
  0x24   : > { %p339_p11 = scmp.lt.s32.totalorder (!%p282_p9), %s780_s11, 31  ;;  %s1135_s12 = scalar_lea.vmem (!%p282_p9), [#allocation3], %s777_s10 }
  0x25   : > { %p782_p12 = scmp.ne.s32.totalorder (!%p282_p9), %s1003_s14, 0 }
  0x27   : > { %s1228_s9 = smov (!%p327_p10, %s778_s9), 31  ;;  %s1230_s11 = smov (!%p339_p11, %s780_s11), 31 }
  0x28   : > { %s779_s21 = sshll.u32 %s1228_s9, 3  ;;  %s781_s26 = sshll.u32 %s1230_s11, 3 }
  0x29   : > { %s1128_s24 = scalar_lea.vmem %s1212_s1, %s779_s21  ;;  %s1133_s29 = scalar_lea.vmem %s1214_s3, %s781_s26 }
  0x2a   : > { %350 = sbr.rel (%p782_p12) target bundleno = 56 (0x38), region = 74 }
  0x2f   : > { %v1021_v16 = vmov 0.0  }
  0x30   : > { %351 = vst [vmem:[#allocation2 + $0x30] sm:$0xff] %v1021_v16  ;;  %352 = vst [vmem:[#allocation2] sm:$0xff] %v1021_v16 }
  0x31   : > { %353 = vst [vmem:[#allocation2 + $0x58] sm:$0xff] %v1021_v16  ;;  %354 = vst [vmem:[#allocation2 + $0x18] sm:$0xff] %v1021_v16 }
  0x32   : > { %355 = vst [vmem:[#allocation2 + $0x50] sm:$0xff] %v1021_v16  ;;  %356 = vst [vmem:[#allocation2 + $0x68] sm:$0xff] %v1021_v16 }
  0x33   : > { %357 = vst [vmem:[#allocation2 + $0x8] sm:$0xff] %v1021_v16  ;;  %358 = vst [vmem:[#allocation2 + $0x48] sm:$0xff] %v1021_v16 }
  0x34   : > { %359 = vst [vmem:[#allocation2 + $0x40] sm:$0xff] %v1021_v16  ;;  %360 = vst [vmem:[#allocation2 + $0x20] sm:$0xff] %v1021_v16 }
  0x35   : > { %361 = vst [vmem:[#allocation2 + $0x10] sm:$0xff] %v1021_v16  ;;  %362 = vst [vmem:[#allocation2 + $0x38] sm:$0xff] %v1021_v16 }
  0x36   : > { %363 = vst [vmem:[#allocation2 + $0x60] sm:$0xff] %v1021_v16  ;;  %364 = vst [vmem:[#allocation2 + $0x70] sm:$0xff] %v1021_v16 }
  0x37   : > { %365 = vst [vmem:[#allocation2 + $0x78] sm:$0xff] %v1021_v16  ;;  %366 = vst [vmem:[#allocation2 + $0x28] sm:$0xff] %v1021_v16 }
  0x38 PF: > { %v414_v17 = vld [vmem:[%s1128_s24 + $0x78] sm:$0xff]  ;;  %v413_v18 = vld [vmem:[%s1128_s24 + $0x70] sm:$0xff]  ;;  %v412_v19 = vld [vmem:[%s1128_s24 + $0x68] sm:$0xff]  ;;  %p783_p13 = scmp.ne.s32.totalorder %s1003_s14, 1 }
  0x39   : > { %820 = vmatprep.subr.mxu0 %v414_v17  ;;  %876 = vmatprep.subr.mxu1 %v414_v17  ;;  %v411_v20 = vld [vmem:[%s1128_s24 + $0x60] sm:$0xff]  ;;  %v410_v21 = vld [vmem:[%s1128_s24 + $0x58] sm:$0xff]  ;;  %v409_v22 = vld [vmem:[%s1128_s24 + $0x50] sm:$0xff] }
  0x3a   : > { %821 = vmatpush3.msra.mxu0 %v414_v17  ;;  %892 = vmatpush3.msra.mxu1 %v414_v17  ;;  %v408_v23 = vld [vmem:[%s1128_s24 + $0x48] sm:$0xff]  ;;  %v407_v24 = vld [vmem:[%s1128_s24 + $0x40] sm:$0xff]  ;;  %v406_v25 = vld [vmem:[%s1128_s24 + $0x38] sm:$0xff] }
  0x3b   : > { %822 = vmatprep.subr.mxu0 %v413_v18  ;;  %877 = vmatprep.subr.mxu1 %v413_v18  ;;  %v405_v26 = vld [vmem:[%s1128_s24 + $0x30] sm:$0xff]  ;;  %v404_v27 = vld [vmem:[%s1128_s24 + $0x28] sm:$0xff]  ;;  %v403_v28 = vld [vmem:[%s1128_s24 + $0x20] sm:$0xff] }
  0x3c   : > { %823 = vmatpush3.msra.mxu0 %v413_v18  ;;  %893 = vmatpush3.msra.mxu1 %v413_v18  ;;  %v402_v29 = vld [vmem:[%s1128_s24 + $0x18] sm:$0xff]  ;;  %v401_v30 = vld [vmem:[%s1128_s24 + $0x10] sm:$0xff]  ;;  %v400_v31 = vld [vmem:[%s1128_s24 + $0x8] sm:$0xff] }
  0x3d   : > { %824 = vmatprep.subr.mxu0 %v412_v19  ;;  %878 = vmatprep.subr.mxu1 %v412_v19  ;;  %v399_v32 = vld [vmem:[%s1128_s24] sm:$0xff]  ;;  %v384_v35 = vld [vmem:[%s1135_s12 + $0x8] sm:$0xff]  ;;  %v385_v37 = vld [vmem:[%s1135_s12 + $0x10] sm:$0xff] }
  0x3e   : > { %825 = vmatpush3.msra.mxu0 %v412_v19  ;;  %894 = vmatpush3.msra.mxu1 %v412_v19  ;;  %v383_v33 = vld [vmem:[%s1135_s12] sm:$0xff]  ;;  %v392_v36 = vld [vmem:[%s1135_s12 + $0x48] sm:$0xff]  ;;  %v393_v38 = vld [vmem:[%s1135_s12 + $0x50] sm:$0xff] }
  0x3f   : > { %826 = vmatprep.subr.mxu0 %v411_v20  ;;  %879 = vmatprep.subr.mxu1 %v411_v20  ;;  %v391_v34 = vld [vmem:[%s1135_s12 + $0x40] sm:$0xff]  ;;  %v386_v39 = vld [vmem:[%s1135_s12 + $0x18] sm:$0xff]  ;;  %v388_v43 = vld [vmem:[%s1135_s12 + $0x28] sm:$0xff] }
  0x40   : > { %827 = vmatpush3.msra.mxu0 %v411_v20  ;;  %895 = vmatpush3.msra.mxu1 %v411_v20  ;;  %v394_v40 = vld [vmem:[%s1135_s12 + $0x58] sm:$0xff]  ;;  %v387_v41 = vld [vmem:[%s1135_s12 + $0x20] sm:$0xff]  ;;  %v396_v44 = vld [vmem:[%s1135_s12 + $0x68] sm:$0xff] }
  0x41   : > { %828 = vmatprep.subr.mxu0 %v410_v21  ;;  %880 = vmatprep.subr.mxu1 %v410_v21  ;;  %v395_v42 = vld [vmem:[%s1135_s12 + $0x60] sm:$0xff]  ;;  %v389_v45 = vld [vmem:[%s1135_s12 + $0x30] sm:$0xff]  ;;  %v390_v47 = vld [vmem:[%s1135_s12 + $0x38] sm:$0xff] }
  0x42   : > { %829 = vmatpush3.msra.mxu0 %v410_v21  ;;  %896 = vmatpush3.msra.mxu1 %v410_v21  ;;  %v397_v46 = vld [vmem:[%s1135_s12 + $0x70] sm:$0xff]  ;;  %v398_v48 = vld [vmem:[%s1135_s12 + $0x78] sm:$0xff]  ;;  %v368_v49 = vld [vmem:[#allocation2] sm:$0xff] }
  0x43   : > { %830 = vmatprep.subr.mxu0 %v409_v22  ;;  %881 = vmatprep.subr.mxu1 %v409_v22  ;;  %v376_v50 = vld [vmem:[#allocation2 + $0x20] sm:$0xff]  ;;  %v367_v53 = vld [vmem:[#allocation2 + $0x30] sm:$0xff]  ;;  %v370_v59 = vld [vmem:[#allocation2 + $0x18] sm:$0xff] }
  0x44   : > { %831 = vmatpush3.msra.mxu0 %v409_v22  ;;  %897 = vmatpush3.msra.mxu1 %v409_v22  ;;  %v375_v54 = vld [vmem:[#allocation2 + $0x40] sm:$0xff]  ;;  %v378_v60 = vld [vmem:[#allocation2 + $0x38] sm:$0xff]  ;;  %v377_v2 = vld [vmem:[#allocation2 + $0x10] sm:$0xff] }
  0x45   : > { %832 = vmatprep.subr.mxu0 %v408_v23  ;;  %882 = vmatprep.subr.mxu1 %v408_v23  ;;  %v369_v1 = vld [vmem:[#allocation2 + $0x58] sm:$0xff]  ;;  %v372_v7 = vld [vmem:[#allocation2 + $0x68] sm:$0xff]  ;;  %v380_v8 = vld [vmem:[#allocation2 + $0x70] sm:$0xff] }
  0x46   : > { %833 = vmatpush3.msra.mxu0 %v408_v23  ;;  %898 = vmatpush3.msra.mxu1 %v408_v23  ;;  %v371_v13 = vld [vmem:[#allocation2 + $0x50] sm:$0xff]  ;;  %v379_v14 = vld [vmem:[#allocation2 + $0x60] sm:$0xff]  ;;  %v374_v19 = vld [vmem:[#allocation2 + $0x48] sm:$0xff] }
  0x47   : > { %834 = vmatprep.subr.mxu0 %v407_v24  ;;  %883 = vmatprep.subr.mxu1 %v407_v24  ;;  %v382_v20 = vld [vmem:[#allocation2 + $0x28] sm:$0xff] }
  0x48   : > { %835 = vmatpush3.msra.mxu0 %v407_v24  ;;  %899 = vmatpush3.msra.mxu1 %v407_v24 }
  0x49   : > { %836 = vmatprep.subr.mxu0 %v406_v25  ;;  %884 = vmatprep.subr.mxu1 %v406_v25 }
  0x4a   : > { %837 = vmatpush3.msra.mxu0 %v406_v25  ;;  %900 = vmatpush3.msra.mxu1 %v406_v25  ;;  %v373_v25 = vld [vmem:[#allocation2 + $0x8] sm:$0xff] }
  0x4b   : > { %838 = vmatprep.subr.mxu0 %v405_v26  ;;  %885 = vmatprep.subr.mxu1 %v405_v26 }
  0x4c   : > { %839 = vmatpush3.msra.mxu0 %v405_v26  ;;  %901 = vmatpush3.msra.mxu1 %v405_v26  ;;  %v381_v26 = vld [vmem:[#allocation2 + $0x78] sm:$0xff] }
  0x4d   : > { %840 = vmatprep.subr.mxu0 %v404_v27  ;;  %886 = vmatprep.subr.mxu1 %v404_v27 }
  0x4e   : > { %841 = vmatpush3.msra.mxu0 %v404_v27  ;;  %902 = vmatpush3.msra.mxu1 %v404_v27 }
  0x4f   : > { %842 = vmatprep.subr.mxu0 %v403_v28  ;;  %887 = vmatprep.subr.mxu1 %v403_v28 }
  0x50   : > { %843 = vmatpush3.msra.mxu0 %v403_v28  ;;  %903 = vmatpush3.msra.mxu1 %v403_v28 }
  0x51   : > { %844 = vmatprep.subr.mxu0 %v402_v29  ;;  %888 = vmatprep.subr.mxu1 %v402_v29 }
  0x52   : > { %845 = vmatpush3.msra.mxu0 %v402_v29  ;;  %904 = vmatpush3.msra.mxu1 %v402_v29 }
  0x53   : > { %846 = vmatprep.subr.mxu0 %v401_v30  ;;  %889 = vmatprep.subr.mxu1 %v401_v30 }
  0x54   : > { %847 = vmatpush3.msra.mxu0 %v401_v30  ;;  %905 = vmatpush3.msra.mxu1 %v401_v30 }
  0x55   : > { %848 = vmatprep.subr.mxu0 %v400_v31  ;;  %890 = vmatprep.subr.mxu1 %v400_v31 }
  0x56   : > { %849 = vmatpush3.msra.mxu0 %v400_v31  ;;  %906 = vmatpush3.msra.mxu1 %v400_v31 }
  0x57   : > { %850 = vmatprep.subr.mxu0 %v399_v32  ;;  %891 = vmatprep.subr.mxu1 %v399_v32 }
  0x58   : > { %851 = vmatpush3.msra.mxu0 %v399_v32  ;;  %907 = vmatpush3.msra.mxu1 %v399_v32 }
  0x59   : > { %852 = vmatprep.mubr.f32.mxu0 %v383_v33  ;;  %864 = vmatprep.mubr.f32.mxu1 %v391_v34 }
  0x5a   : > { %853 = vmatmul.mubr.f32.vlgmr.msra.gmra.mxu0 %v384_v35  ;;  %865 = vmatmul.mubr.f32.vlgmr.msra.gmra.mxu1 %v392_v36 }
  0x5b   : > { %855 = vmatprep.mubr.f32.mxu0 %v385_v37  ;;  %867 = vmatprep.mubr.f32.mxu1 %v393_v38 }
  0x5e   : > { %856 = vmatmul.mubr.f32.gmra.mxu0 %v386_v39  ;;  %868 = vmatmul.mubr.f32.gmra.mxu1 %v394_v40 }
  0x5f   : > { %858 = vmatprep.mubr.f32.mxu0 %v387_v41  ;;  %870 = vmatprep.mubr.f32.mxu1 %v395_v42 }
  0x62   : > { %859 = vmatmul.mubr.f32.gmra.mxu0 %v388_v43  ;;  %871 = vmatmul.mubr.f32.gmra.mxu1 %v396_v44 }
  0x63   : > { %861 = vmatprep.mubr.f32.mxu0 %v389_v45  ;;  %873 = vmatprep.mubr.f32.mxu1 %v397_v46 }
  0x66   : > { %862 = vmatmul.mubr.f32.gmra.mxu0 %v390_v47  ;;  %874 = vmatmul.mubr.f32.gmra.mxu1 %v398_v48 }
 0x11a   : > { %v854_v51 = vpop.f32.mrf.mxu0  ;;  %v866_v52 = vpop.f32.mrf.mxu1 }
 0x11b   : > { %v561_v55 = vadd.f32 %v854_v51, %v368_v49  ;;  %v569_v56 = vadd.f32 %v866_v52, %v376_v50 }
 0x11c   : > { %v481_v57 = vpop.f32.mrf.mxu0  ;;  %v521_v58 = vpop.f32.mrf.mxu1 }
 0x11d   : > { %577 = vst [vmem:[#allocation2] sm:$0xff] %v561_v55  ;;  %585 = vst [vmem:[#allocation2 + $0x20] sm:$0xff] %v569_v56  ;;  %v560_v61 = vadd.f32 %v481_v57, %v367_v53  ;;  %v568_v62 = vadd.f32 %v521_v58, %v375_v54 }
 0x11e   : > { %v857_v63 = vpop.f32.mrf.mxu0  ;;  %v869_v0 = vpop.f32.mrf.mxu1 }
 0x11f   : > { %576 = vst [vmem:[#allocation2 + $0x30] sm:$0xff] %v560_v61  ;;  %584 = vst [vmem:[#allocation2 + $0x40] sm:$0xff] %v568_v62  ;;  %v563_v3 = vadd.f32 %v857_v63, %v370_v59  ;;  %v571_v4 = vadd.f32 %v869_v0, %v378_v60 }
 0x120   : > { %v491_v5 = vpop.f32.mrf.mxu0  ;;  %v531_v6 = vpop.f32.mrf.mxu1 }
 0x121   : > { %579 = vst [vmem:[#allocation2 + $0x18] sm:$0xff] %v563_v3  ;;  %587 = vst [vmem:[#allocation2 + $0x38] sm:$0xff] %v571_v4  ;;  %v562_v9 = vadd.f32 %v491_v5, %v369_v1  ;;  %v570_v10 = vadd.f32 %v531_v6, %v377_v2 }
 0x122   : > { %v860_v11 = vpop.f32.mrf.mxu0  ;;  %v872_v12 = vpop.f32.mrf.mxu1 }
 0x123   : > { %578 = vst [vmem:[#allocation2 + $0x58] sm:$0xff] %v562_v9  ;;  %586 = vst [vmem:[#allocation2 + $0x10] sm:$0xff] %v570_v10  ;;  %v565_v15 = vadd.f32 %v860_v11, %v372_v7  ;;  %v573_v16 = vadd.f32 %v872_v12, %v380_v8 }
 0x124   : > { %v501_v17 = vpop.f32.mrf.mxu0  ;;  %v541_v18 = vpop.f32.mrf.mxu1 }
 0x125   : > { %581 = vst [vmem:[#allocation2 + $0x68] sm:$0xff] %v565_v15  ;;  %589 = vst [vmem:[#allocation2 + $0x70] sm:$0xff] %v573_v16  ;;  %v564_v21 = vadd.f32 %v501_v17, %v371_v13  ;;  %v572_v22 = vadd.f32 %v541_v18, %v379_v14 }
 0x126   : > { %v863_v23 = vpop.f32.mrf.mxu0  ;;  %v875_v24 = vpop.f32.mrf.mxu1 }
 0x127   : > { %580 = vst [vmem:[#allocation2 + $0x50] sm:$0xff] %v564_v21  ;;  %588 = vst [vmem:[#allocation2 + $0x60] sm:$0xff] %v572_v22  ;;  %v567_v27 = vadd.f32 %v863_v23, %v374_v19  ;;  %v575_v28 = vadd.f32 %v875_v24, %v382_v20  ;;  %595 = sbr.rel (%p783_p13) target bundleno = 311 (0x137), region = 78 }
 0x128   : > { %v511_v29 = vpop.f32.mrf.mxu0  ;;  %v551_v30 = vpop.f32.mrf.mxu1 }
 0x129   : > { %583 = vst [vmem:[#allocation2 + $0x48] sm:$0xff] %v567_v27  ;;  %591 = vst [vmem:[#allocation2 + $0x28] sm:$0xff] %v575_v28  ;;  %v566_v31 = vadd.f32 %v511_v29, %v373_v25  ;;  %v574_v32 = vadd.f32 %v551_v30, %v381_v26 }
 0x12b   : > { %582 = vst [vmem:[#allocation2 + $0x8] sm:$0xff] %v566_v31  ;;  %590 = vst [vmem:[#allocation2 + $0x78] sm:$0xff] %v574_v32 }
 0x12c   : > { %v596_v33 = vld [vmem:[#allocation2 + $0x30] sm:$0xff]  ;;  %v784_v34 = vld [vmem:[%s1213_s2] ss:$0 sm:$0xff]  ;;  %v598_v38 = vld [vmem:[#allocation2 + $0x58] sm:$0xff] }
 0x12d   : > { %v597_v35 = vld [vmem:[#allocation2] sm:$0xff]  ;;  %v619_v36 = vadd.f32 %v784_v34, %v596_v33  ;;  %v599_v39 = vld [vmem:[#allocation2 + $0x18] sm:$0xff]  ;;  %v621_v41 = vadd.f32 %v784_v34, %v598_v38  ;;  %v601_v44 = vld [vmem:[#allocation2 + $0x68] sm:$0xff] }
 0x12e   : > { %v620_v37 = vadd.f32 %v784_v34, %v597_v35  ;;  %v600_v40 = vld [vmem:[#allocation2 + $0x50] sm:$0xff]  ;;  %v622_v42 = vadd.f32 %v784_v34, %v599_v39  ;;  %v624_v47 = vadd.f32 %v784_v34, %v601_v44  ;;  %v604_v50 = vld [vmem:[#allocation2 + $0x40] sm:$0xff]  ;;  %v607_v56 = vld [vmem:[#allocation2 + $0x38] sm:$0xff] }
 0x12f   : > { %v623_v43 = vadd.f32 %v784_v34, %v600_v40  ;;  %635 = vst [vmem:[%s1133_s29] sm:$0xff] %v619_v36  ;;  %v605_v51 = vld [vmem:[#allocation2 + $0x20] sm:$0xff]  ;;  %v606_v52 = vld [vmem:[#allocation2 + $0x10] sm:$0xff]  ;;  %637 = vst [vmem:[%s1133_s29 + $0x10] sm:$0xff] %v621_v41  ;;  %v627_v53 = vadd.f32 %v784_v34, %v604_v50  ;;  %v630_v59 = vadd.f32 %v784_v34, %v607_v56 }
 0x130   : > { %v603_v46 = vld [vmem:[#allocation2 + $0x48] sm:$0xff]  ;;  %636 = vst [vmem:[%s1133_s29 + $0x8] sm:$0xff] %v620_v37  ;;  %638 = vst [vmem:[%s1133_s29 + $0x18] sm:$0xff] %v622_v42  ;;  %v628_v54 = vadd.f32 %v784_v34, %v605_v51  ;;  %v629_v55 = vadd.f32 %v784_v34, %v606_v52  ;;  %v608_v57 = vld [vmem:[#allocation2 + $0x60] sm:$0xff] }
 0x131   : > { %v626_v49 = vadd.f32 %v784_v34, %v603_v46  ;;  %639 = vst [vmem:[%s1133_s29 + $0x20] sm:$0xff] %v623_v43  ;;  %v609_v58 = vld [vmem:[#allocation2 + $0x70] sm:$0xff]  ;;  %640 = vst [vmem:[%s1133_s29 + $0x28] sm:$0xff] %v624_v47  ;;  %v631_v60 = vadd.f32 %v784_v34, %v608_v57  ;;  %v611_v63 = vld [vmem:[#allocation2 + $0x28] sm:$0xff] }
 0x132   : > { %v602_v45 = vld [vmem:[#allocation2 + $0x8] sm:$0xff]  ;;  %v632_v61 = vadd.f32 %v784_v34, %v609_v58  ;;  %v610_v62 = vld [vmem:[#allocation2 + $0x78] sm:$0xff]  ;;  %643 = vst [vmem:[%s1133_s29 + $0x40] sm:$0xff] %v627_v53  ;;  %644 = vst [vmem:[%s1133_s29 + $0x48] sm:$0xff] %v628_v54  ;;  %v634_v1 = vadd.f32 %v784_v34, %v611_v63 }
 0x133   : > { %v625_v48 = vadd.f32 %v784_v34, %v602_v45  ;;  %642 = vst [vmem:[%s1133_s29 + $0x38] sm:$0xff] %v626_v49  ;;  %645 = vst [vmem:[%s1133_s29 + $0x50] sm:$0xff] %v629_v55  ;;  %v633_v0 = vadd.f32 %v784_v34, %v610_v62 }
 0x134   : > { %646 = vst [vmem:[%s1133_s29 + $0x58] sm:$0xff] %v630_v59  ;;  %647 = vst [vmem:[%s1133_s29 + $0x60] sm:$0xff] %v631_v60 }
 0x135   : > { %641 = vst [vmem:[%s1133_s29 + $0x30] sm:$0xff] %v625_v48  ;;  %648 = vst [vmem:[%s1133_s29 + $0x68] sm:$0xff] %v632_v61 }
 0x136   : > { %649 = vst [vmem:[%s1133_s29 + $0x70] sm:$0xff] %v633_v0  ;;  %650 = vst [vmem:[%s1133_s29 + $0x78] sm:$0xff] %v634_v1 }
 0x137 PF: > { %s13_s18 = sadd.s32 1, %s1019_s18   ;;  %s1215_s12 = smov %s999_s13 }
 0x138   : > { %p10_p0 = scmp.ge.s32.totalorder %s13_s18, 6   ;;  %s1216_s13 = smov %s1093_s25 }
 0x139   : > { %s1217_s14 = smov %s1011_s16  ;;  %s1218_s15 = smov %s1015_s17 }
 0x13a   : > { %s1219_s16 = smov %s1222_s19  ;;  %s1220_s17 = smov %s1226_s20 }
 0x13b   :  { %12 = sbr.rel (!%p10_p0) target bundleno = 4 (0x4), region = 119 }

</bundles_post_ra>
